<compile_context>
chip_gen: v7x
topology: tpu7x:2x2x1
jax: 0.10.0
libtpu: 0.0.40
codegen_flags: <defaults>
</compile_context>

<pallas_src>
import math
import jax
import jax.numpy as jnp
from jax import lax
from jax.experimental import pallas as pl
from jax.experimental.pallas import tpu as pltpu

D = 128
SCALE = math.sqrt(D)
INV_SCALE = 1.0 / SCALE
NEG_BIG = -1e30  # finite "−inf" so the first online-softmax step never NaNs


def flash_attn_kernel(q_ref, k_ref, v_ref, mask_ref, o_ref, m_scr, l_scr, acc_scr):
    kv = pl.program_id(2)

    @pl.when(kv == 0)
    def _():
        m_scr[...] = jnp.full_like(m_scr, NEG_BIG)
        l_scr[...] = jnp.zeros_like(l_scr)
        acc_scr[...] = jnp.zeros_like(acc_scr)

    # Fold 1/sqrt(D) into q (G, tq, D): cheaper than scaling the (tq, tk) scores.
    q = q_ref[...].astype(jnp.float32) * INV_SCALE

    # Scores: batched q @ k^T in k's native (tk, D) layout (no XLU transpose).
    s = jnp.einsum(
        "gsd,gtd->gst", q, k_ref[...].astype(jnp.float32),
        precision=lax.Precision.HIGHEST,
        preferred_element_type=jnp.float32,
    ) + mask_ref[...]

    # Online softmax update.
    m_prev = m_scr[...]
    m_new = jnp.maximum(m_prev, jnp.max(s, axis=-1, keepdims=True))
    alpha = jnp.exp(m_prev - m_new)
    p = jnp.exp(s - m_new)

    l_scr[...] = alpha * l_scr[...] + jnp.sum(p, axis=-1, keepdims=True)
    acc_scr[...] = alpha * acc_scr[...] + jnp.einsum(
        "gst,gtd->gsd", p, v_ref[...].astype(jnp.float32),
        precision=lax.Precision.HIGHEST,
        preferred_element_type=jnp.float32,
    )
    m_scr[...] = m_new

    @pl.when(kv == pl.num_programs(2) - 1)
    def _():
        # Deferred normalization: exact reciprocal of the tiny (G, tq, 1) denom,
        # then one (G, tq, D) multiply.
        r = 1.0 / l_scr[...]
        o_ref[...] = (acc_scr[...] * r).astype(o_ref.dtype)


def _vmem_budget_and_limit():
    """Generation-aware VMEM block budget and scoped-VMEM limit."""
    try:
        cap = pltpu.get_tpu_info().vmem_capacity_bytes
    except Exception:
        cap = 64 << 20  # conservative fallback (v7x-like)
    if cap >= (128 << 20):          # v5e / v6e: 128 MiB VMEM
        return 28 << 20, 64 << 20
    return 16 << 20, 40 << 20       # v7x-like: 64 MiB physical VMEM


def _pick_tiles(S):
    """(tq, tk) tiles satisfying the (8, 128) layout constraint."""
    if S % 128 == 0:
        tq = 128
        tk = 512 if S % 512 == 0 else (256 if S % 256 == 0 else 128)
    else:
        # Small / odd S: use the full extent (allowed since it equals the dim).
        tq = tk = S
    return tq, tk


def _pick_group(BH, S, d, tq, tk, budget_bytes):
    """Largest divisor G of BH whose per-step VMEM footprint fits the budget,
    capped so the parallel grid keeps >= 2 steps (two v7x TensorCores)."""
    n_q = S // tq
    max_g = BH
    if n_q < 2 and BH >= 2:
        max_g = BH // 2

    def step_bytes(g):
        # double-buffered pipelined blocks: q, out (tq*d), k, v (tk*d), mask (tq*tk)
        io = 2 * 4 * g * (2 * tq * d + 2 * tk * d + tq * tk)
        # persistent scratch: acc (tq*d) + m, l (tq each)
        scratch = 4 * g * (tq * d + 2 * tq)
        # score/prob/exp intermediates inside the kernel body
        temps = 3 * 4 * g * tq * tk
        return io + scratch + temps

    for g in range(max_g, 0, -1):
        if BH % g == 0 and step_bytes(g) <= budget_bytes:
            return g
    return 1


def sdpa_pallas(q, k, v, attn_mask):
    """q, k, v: (B, H, S, D) f32; attn_mask: (B, H, S, S) f32 -> (B, H, S, D)."""
    B, H, S, d = q.shape
    assert d == D
    BH = B * H
    qf = q.reshape(BH, S, d)
    kf = k.reshape(BH, S, d)
    vf = v.reshape(BH, S, d)
    mf = attn_mask.reshape(BH, S, S)

    tq, tk = _pick_tiles(S)
    budget, vmem_limit = _vmem_budget_and_limit()
    G = _pick_group(BH, S, d, tq, tk, budget)
    n_q = S // tq
    n_kv = S // tk

    out = pl.pallas_call(
        flash_attn_kernel,
        out_shape=jax.ShapeDtypeStruct((BH, S, d), q.dtype),
        grid_spec=pltpu.PrefetchScalarGridSpec(
            num_scalar_prefetch=0,
            grid=(BH // G, n_q, n_kv),
            in_specs=[
                pl.BlockSpec((G, tq, d), lambda g, i, j: (g, i, 0)),   # q
                pl.BlockSpec((G, tk, d), lambda g, i, j: (g, j, 0)),   # k
                pl.BlockSpec((G, tk, d), lambda g, i, j: (g, j, 0)),   # v
                pl.BlockSpec((G, tq, tk), lambda g, i, j: (g, i, j)),  # mask
            ],
            out_specs=pl.BlockSpec((G, tq, d), lambda g, i, j: (g, i, 0)),
            scratch_shapes=[
                pltpu.VMEM((G, tq, 1), jnp.float32),   # running max m
                pltpu.VMEM((G, tq, 1), jnp.float32),   # running denom l
                pltpu.VMEM((G, tq, d), jnp.float32),   # unnormalized acc
            ],
        ),
        compiler_params=pltpu.CompilerParams(
            dimension_semantics=("parallel", "parallel", "arbitrary"),
            vmem_limit_bytes=vmem_limit,
        ),
    )(qf, kf, vf, mf)
    return out.reshape(B, H, S, d)


def sdpa_ref(q, k, v, attn_mask):
    s = jnp.einsum("bhsd,bhtd->bhst", q, k,
                   precision=lax.Precision.HIGHEST,
                   preferred_element_type=jnp.float32) / SCALE + attn_mask
    p = jax.nn.softmax(s, axis=-1)
    return jnp.einsum("bhst,bhtd->bhsd", p, v,
                      precision=lax.Precision.HIGHEST,
                      preferred_element_type=jnp.float32)


if __name__ == "__main__":
    key = jax.random.PRNGKey(0)
    kq, kk, kv, km = jax.random.split(key, 4)

    B, H, S = 2, 2, 8
    q = jax.random.normal(kq, (B, H, S, D), dtype=jnp.float32)
    k = jax.random.normal(kk, (B, H, S, D), dtype=jnp.float32)
    v = jax.random.normal(kv, (B, H, S, D), dtype=jnp.float32)
    attn_mask = jax.random.normal(km, (B, H, S, S), dtype=jnp.float32)

    out = sdpa_pallas(q, k, v, attn_mask)
    jax.block_until_ready(out)

    ref = sdpa_ref(q, k, v, attn_mask)
    assert out.shape == (B, H, S, D)
    assert jnp.allclose(out, ref, atol=1e-5, rtol=1e-5), "mismatch vs reference"

    print("KERNEL_OK")
</pallas_src>

<mosaic_0001>
module attributes {stable_mosaic.version = 11 : i64} {
  func.func @flash_attn_kernel(%arg0: i32, %arg1: i32, %arg2: i32, %arg3: memref<2x8x128xf32, #tpu.memory_space<vmem>>, %arg4: memref<2x8x128xf32, #tpu.memory_space<vmem>>, %arg5: memref<2x8x128xf32, #tpu.memory_space<vmem>>, %arg6: memref<2x8x8xf32, #tpu.memory_space<vmem>>, %arg7: memref<2x8x128xf32, #tpu.memory_space<vmem>>, %arg8: memref<2x8x1xf32, #tpu.memory_space<vmem>>, %arg9: memref<2x8x1xf32, #tpu.memory_space<vmem>>, %arg10: memref<2x8x128xf32, #tpu.memory_space<vmem>>) attributes {dimension_semantics = [#tpu.dimension_semantics<parallel>, #tpu.dimension_semantics<parallel>, #tpu.dimension_semantics<arbitrary>], iteration_bounds = array<i64: 2, 1, 1>, scalar_prefetch = 0 : i64, scratch_operands = 3 : i64, tpu.core_type = #tpu.core_type<tc>, window_params = [{transform_indices = @transform_0, window_bounds = array<i64: 2, 8, 128>}, {transform_indices = @transform_1, window_bounds = array<i64: 2, 8, 128>}, {transform_indices = @transform_2, window_bounds = array<i64: 2, 8, 128>}, {transform_indices = @transform_3, window_bounds = array<i64: 2, 8, 8>}, {transform_indices = @transform_4, window_bounds = array<i64: 2, 8, 128>}]} {
    %c0_i32 = arith.constant 0 : i32
    %0 = arith.cmpi eq, %arg2, %c0_i32 : i32
    %1 = arith.extui %0 : i1 to i32
    %c0_i32_0 = arith.constant 0 : i32
    %2 = arith.cmpi ne, %1, %c0_i32_0 : i32
    scf.if %2 {
      %cst_36 = arith.constant -1.000000e+30 : f32
      %36 = vector.broadcast %cst_36 : f32 to vector<2x8x1xf32>
      %c0_37 = arith.constant 0 : index
      %c0_38 = arith.constant 0 : index
      %c0_39 = arith.constant 0 : index
      %37 = vector.load %arg8[%c0_37, %c0_38, %c0_39] : memref<2x8x1xf32, #tpu.memory_space<vmem>>, vector<2x8x1xf32>
      tpu.vector_store %arg8[%c0_37, %c0_38, %c0_39], %36 {strides = array<i32>} : memref<2x8x1xf32, #tpu.memory_space<vmem>>, vector<2x8x1xf32>,
      %cst_40 = arith.constant 0.000000e+00 : f32
      %38 = vector.broadcast %cst_40 : f32 to vector<2x8x1xf32>
      %c0_41 = arith.constant 0 : index
      %c0_42 = arith.constant 0 : index
      %c0_43 = arith.constant 0 : index
      %39 = vector.load %arg9[%c0_41, %c0_42, %c0_43] : memref<2x8x1xf32, #tpu.memory_space<vmem>>, vector<2x8x1xf32>
      tpu.vector_store %arg9[%c0_41, %c0_42, %c0_43], %38 {strides = array<i32>} : memref<2x8x1xf32, #tpu.memory_space<vmem>>, vector<2x8x1xf32>,
      %cst_44 = arith.constant 0.000000e+00 : f32
      %40 = vector.broadcast %cst_44 : f32 to vector<2x8x128xf32>
      %c0_45 = arith.constant 0 : index
      %c0_46 = arith.constant 0 : index
      %c0_47 = arith.constant 0 : index
      %41 = vector.load %arg10[%c0_45, %c0_46, %c0_47] : memref<2x8x128xf32, #tpu.memory_space<vmem>>, vector<2x8x128xf32>
      tpu.vector_store %arg10[%c0_45, %c0_46, %c0_47], %40 {strides = array<i32>} : memref<2x8x128xf32, #tpu.memory_space<vmem>>, vector<2x8x128xf32>,
    } else {
    }
    %c0 = arith.constant 0 : index
    %c0_1 = arith.constant 0 : index
    %c0_2 = arith.constant 0 : index
    %3 = vector.load %arg3[%c0, %c0_1, %c0_2] : memref<2x8x128xf32, #tpu.memory_space<vmem>>, vector<2x8x128xf32>
    %cst = arith.constant 0.0883883461 : f32
    %4 = vector.broadcast %cst : f32 to vector<2x8x128xf32>
    %5 = arith.mulf %3, %4 : vector<2x8x128xf32>
    %c0_3 = arith.constant 0 : index
    %c0_4 = arith.constant 0 : index
    %c0_5 = arith.constant 0 : index
    %6 = vector.load %arg4[%c0_3, %c0_4, %c0_5] : memref<2x8x128xf32, #tpu.memory_space<vmem>>, vector<2x8x128xf32>
    "tpu.trace_start"() <{level = 10 : i32, message = "gsd,gtd->gst"}> : () -> ()
    %cst_6 = arith.constant dense<0.000000e+00> : vector<2x8x8xf32>
    %7 = tpu.matmul %5, %6, %cst_6 {dimension_numbers = #tpu.dot_dimension_numbers<[2], [2], [1], [1], [0, 0, 0, 1, 1, 1], [0], [0]>, precision = #tpu.contract_precision<fp32>} : vector<2x8x128xf32>, vector<2x8x128xf32>, vector<2x8x8xf32> -> vector<2x8x8xf32>
    "tpu.trace_stop"() : () -> ()
    %c0_7 = arith.constant 0 : index
    %c0_8 = arith.constant 0 : index
    %c0_9 = arith.constant 0 : index
    %8 = vector.load %arg6[%c0_7, %c0_8, %c0_9] : memref<2x8x8xf32, #tpu.memory_space<vmem>>, vector<2x8x8xf32>
    %9 = arith.addf %7, %8 : vector<2x8x8xf32>
    %c0_10 = arith.constant 0 : index
    %c0_11 = arith.constant 0 : index
    %c0_12 = arith.constant 0 : index
    %10 = vector.load %arg8[%c0_10, %c0_11, %c0_12] : memref<2x8x1xf32, #tpu.memory_space<vmem>>, vector<2x8x1xf32>
    %cst_13 = arith.constant dense<0xFF800000> : vector<2x8xf32>
    %11 = vector.multi_reduction <maximumf>, %9, %cst_13 [2] : vector<2x8x8xf32> to vector<2x8xf32>
    %12 = vector.shape_cast %11 : vector<2x8xf32> to vector<2x8x1xf32>
    %13 = arith.maximumf %10, %12 : vector<2x8x1xf32>
    %14 = arith.subf %10, %13 : vector<2x8x1xf32>
    %15 = math.exp %14 : vector<2x8x1xf32>
    %16 = vector.broadcast %13 : vector<2x8x1xf32> to vector<2x8x8xf32>
    %17 = arith.subf %9, %16 : vector<2x8x8xf32>
    %18 = math.exp %17 : vector<2x8x8xf32>
    %c0_14 = arith.constant 0 : index
    %c0_15 = arith.constant 0 : index
    %c0_16 = arith.constant 0 : index
    %19 = vector.load %arg9[%c0_14, %c0_15, %c0_16] : memref<2x8x1xf32, #tpu.memory_space<vmem>>, vector<2x8x1xf32>
    %20 = arith.mulf %15, %19 : vector<2x8x1xf32>
    %cst_17 = arith.constant dense<0.000000e+00> : vector<2x8xf32>
    %21 = vector.multi_reduction <add>, %18, %cst_17 [2] : vector<2x8x8xf32> to vector<2x8xf32>
    %22 = vector.shape_cast %21 : vector<2x8xf32> to vector<2x8x1xf32>
    %23 = arith.addf %20, %22 : vector<2x8x1xf32>
    %c0_18 = arith.constant 0 : index
    %c0_19 = arith.constant 0 : index
    %c0_20 = arith.constant 0 : index
    %24 = vector.load %arg9[%c0_18, %c0_19, %c0_20] : memref<2x8x1xf32, #tpu.memory_space<vmem>>, vector<2x8x1xf32>
    tpu.vector_store %arg9[%c0_18, %c0_19, %c0_20], %23 {strides = array<i32>} : memref<2x8x1xf32, #tpu.memory_space<vmem>>, vector<2x8x1xf32>,
    %c0_21 = arith.constant 0 : index
    %c0_22 = arith.constant 0 : index
    %c0_23 = arith.constant 0 : index
    %25 = vector.load %arg10[%c0_21, %c0_22, %c0_23] : memref<2x8x128xf32, #tpu.memory_space<vmem>>, vector<2x8x128xf32>
    %26 = vector.broadcast %15 : vector<2x8x1xf32> to vector<2x8x128xf32>
    %27 = arith.mulf %26, %25 : vector<2x8x128xf32>
    %c0_24 = arith.constant 0 : index
    %c0_25 = arith.constant 0 : index
    %c0_26 = arith.constant 0 : index
    %28 = vector.load %arg5[%c0_24, %c0_25, %c0_26] : memref<2x8x128xf32, #tpu.memory_space<vmem>>, vector<2x8x128xf32>
    "tpu.trace_start"() <{level = 10 : i32, message = "gst,gtd->gsd"}> : () -> ()
    %cst_27 = arith.constant dense<0.000000e+00> : vector<2x8x128xf32>
    %29 = tpu.matmul %18, %28, %cst_27 {dimension_numbers = #tpu.dot_dimension_numbers<[2], [1], [1], [2], [0, 0, 0, 1, 1, 2], [0], [0]>, precision = #tpu.contract_precision<fp32>} : vector<2x8x8xf32>, vector<2x8x128xf32>, vector<2x8x128xf32> -> vector<2x8x128xf32>
    "tpu.trace_stop"() : () -> ()
    %30 = arith.addf %27, %29 : vector<2x8x128xf32>
    %c0_28 = arith.constant 0 : index
    %c0_29 = arith.constant 0 : index
    %c0_30 = arith.constant 0 : index
    %31 = vector.load %arg10[%c0_28, %c0_29, %c0_30] : memref<2x8x128xf32, #tpu.memory_space<vmem>>, vector<2x8x128xf32>
    tpu.vector_store %arg10[%c0_28, %c0_29, %c0_30], %30 {strides = array<i32>} : memref<2x8x128xf32, #tpu.memory_space<vmem>>, vector<2x8x128xf32>,
    %c0_31 = arith.constant 0 : index
    %c0_32 = arith.constant 0 : index
    %c0_33 = arith.constant 0 : index
    %32 = vector.load %arg8[%c0_31, %c0_32, %c0_33] : memref<2x8x1xf32, #tpu.memory_space<vmem>>, vector<2x8x1xf32>
    tpu.vector_store %arg8[%c0_31, %c0_32, %c0_33], %13 {strides = array<i32>} : memref<2x8x1xf32, #tpu.memory_space<vmem>>, vector<2x8x1xf32>,
    %c0_i32_34 = arith.constant 0 : i32
    %33 = arith.cmpi eq, %arg2, %c0_i32_34 : i32
    %34 = arith.extui %33 : i1 to i32
    %c0_i32_35 = arith.constant 0 : i32
    %35 = arith.cmpi ne, %34, %c0_i32_35 : i32
    scf.if %35 {
      %c0_36 = arith.constant 0 : index
      %c0_37 = arith.constant 0 : index
      %c0_38 = arith.constant 0 : index
      %36 = vector.load %arg9[%c0_36, %c0_37, %c0_38] : memref<2x8x1xf32, #tpu.memory_space<vmem>>, vector<2x8x1xf32>
      %cst_39 = arith.constant 1.000000e+00 : f32
      %37 = vector.broadcast %cst_39 : f32 to vector<2x8x1xf32>
      %38 = arith.divf %37, %36 : vector<2x8x1xf32>
      %c0_40 = arith.constant 0 : index
      %c0_41 = arith.constant 0 : index
      %c0_42 = arith.constant 0 : index
      %39 = vector.load %arg10[%c0_40, %c0_41, %c0_42] : memref<2x8x128xf32, #tpu.memory_space<vmem>>, vector<2x8x128xf32>
      %40 = vector.broadcast %38 : vector<2x8x1xf32> to vector<2x8x128xf32>
      %41 = arith.mulf %39, %40 : vector<2x8x128xf32>
      %c0_43 = arith.constant 0 : index
      %c0_44 = arith.constant 0 : index
      %c0_45 = arith.constant 0 : index
      %42 = vector.load %arg7[%c0_43, %c0_44, %c0_45] : memref<2x8x128xf32, #tpu.memory_space<vmem>>, vector<2x8x128xf32>
      tpu.vector_store %arg7[%c0_43, %c0_44, %c0_45], %41 {strides = array<i32>} : memref<2x8x128xf32, #tpu.memory_space<vmem>>, vector<2x8x128xf32>,
    } else {
    }
    return
  }
  func.func @transform_0(%arg0: i32, %arg1: i32, %arg2: i32) -> (i32, i32, i32) {
    %c0_i32 = arith.constant 0 : i32
    %c0_i32_0 = arith.constant 0 : i32
    return %arg0, %arg1, %c0_i32 : i32, i32, i32
  }
  func.func @transform_1(%arg0: i32, %arg1: i32, %arg2: i32) -> (i32, i32, i32) {
    %c0_i32 = arith.constant 0 : i32
    %c0_i32_0 = arith.constant 0 : i32
    return %arg0, %arg2, %c0_i32 : i32, i32, i32
  }
  func.func @transform_2(%arg0: i32, %arg1: i32, %arg2: i32) -> (i32, i32, i32) {
    %c0_i32 = arith.constant 0 : i32
    %c0_i32_0 = arith.constant 0 : i32
    return %arg0, %arg2, %c0_i32 : i32, i32, i32
  }
  func.func @transform_3(%arg0: i32, %arg1: i32, %arg2: i32) -> (i32, i32, i32) {
    %c0_i32 = arith.constant 0 : i32
    return %arg0, %arg1, %arg2 : i32, i32, i32
  }
  func.func @transform_4(%arg0: i32, %arg1: i32, %arg2: i32) -> (i32, i32, i32) {
    %c0_i32 = arith.constant 0 : i32
    %c0_i32_0 = arith.constant 0 : i32
    return %arg0, %arg1, %c0_i32 : i32, i32, i32
  }
}

</mosaic_0001>

<bundles_post_ra>
// kernel: tpu_custom_call.1
= control target key start
LH: loop header
LB: loop body
LE: loop exit
PB: predicated region body
PF: predicated region fallthrough
CT: control target
= control target key end

     0   :  { %s3451_s0 = inlined_call_operand.hbm [shape: f32[4,8,128], index: 0, kind: input, shape index: {}]   ;;  %s3452_s1 = inlined_call_operand.hbm [shape: f32[4,8,128], index: 1, kind: input, shape index: {}]   ;;  %s3453_s2 = inlined_call_operand.hbm [shape: f32[4,8,128], index: 2, kind: input, shape index: {}]   ;;  %s3454_s3 = inlined_call_operand.hbm [shape: f32[4,8,8], index: 3, kind: input, shape index: {}]   ;;  %s3455_s4 = inlined_call_operand.hbm [shape: f32[4,8,128], index: 4, kind: output, shape index: {}]  }
   0x1   :  { %3467 = sst [smem:[#allocation23_spill]] %s3451_s0 }
   0x2   :  { %3468 = sst [smem:[#allocation24_spill]] %s3452_s1 }
   0x3   :  { %9 = vsyncpa [#allocation6], 0 }
   0x4   :  { %11 = vsyncpa [#allocation6 + $0x1], 0 }
   0x5   :  { %12 = vsyncpa [#allocation9], 0 }
   0x6   :  { %14 = vsyncpa [#allocation9 + $0x1], 0 }
   0x7   :  { %15 = vsyncpa [#allocation12], 0 }
   0x8   :  { %17 = vsyncpa [#allocation12 + $0x1], 0 }
   0x9   :  { %18 = vsyncpa [#allocation7], 0 }
   0xa   :  { %20 = vsyncpa [#allocation7 + $0x1], 0  ;;  %s3025_s15 = smov 0   ;;  %s3027_s16 = smov 0  }
   0xb   :  { %s3029_s17 = smov 0   ;;  %s3031_s18 = smov 0  }
   0xc   :  { %s3033_s19 = smov 0   ;;  %s3035_s20 = smov 0  }
   0xd LB: > { %3469 = sst [smem:[#allocation18_spill]] %s2973_s17  ;;  %s3056_s21 = sadd.s32 4294967295, %s2985_s20   ;;  %s2985_s20 = sphi %s3035_s20, %s26_s20   ;;  %s2981_s19 = sphi %s3033_s19, %s3496_s19   ;;  %s2977_s18 = sphi %s3031_s18, %s3495_s18   ;;  %s2973_s17 = sphi %s3029_s17, %s3494_s17   ;;  %s2969_s16 = sphi %s3027_s16, %s3498_s16   ;;  %s2965_s15 = sphi %s3025_s15, %s3497_s15  }
   0xe   : > { %3470 = sst [smem:[#allocation19_spill]] %s2981_s19  ;;  %s2455_s22 = sadd.s32 4294967294, %s2985_s20  }
   0xf   : > { %3471 = sst [smem:[#allocation20_spill]] %s2985_s20  ;;  %s45_s23 = sadd.s32 1, %s2981_s19 }
  0x10   : > { %s54_s24 = sadd.s32 1, %s2973_s17  ;;  %p47_p0 = scmp.ge.s32.totalorder %s45_s23, 2 }
  0x11   : > { %p61_p1 = scmp.ne.s32.totalorder %s2973_s17, %s2969_s16  ;;  %p62_p2 = scmp.eq.s32.totalorder %s2985_s20, 0 }
  0x12   : > { %p67_p3 = scmp.ne.s32.totalorder %s2969_s16, %s2965_s15  ;;  %s3500_s23 = smov (%p47_p0, %s45_s23), 0 }
  0x13   : > { %3472 = sst [smem:[#allocation21_spill]] %s3500_s23  ;;  %p3068_p4 = por %p62_p2, %p61_p1 }
  0x14   : > { %p68_p5 = scmp.eq.s32.totalorder %s3056_s21, 0  ;;  %s49_s26 = ssub.s32 %s2981_s19, %s3500_s23 }
  0x15   : > { %p179_p6 = scmp.eq.s32.totalorder %s3056_s21, 1  ;;  %p52_p7 = scmp.eq.s32.totalorder %s49_s26, 0 }
  0x16   : > { %p3076_p8 = por %p68_p5, %p67_p3  ;;  %p185_p10 = scmp.eq.s32.totalorder %s2455_s22, 1 }
  0x17   : > { %p3080_p9 = por %p179_p6, %p61_p1  ;;  %p2703_p13 = scmp.lt.s32.totalorder %s2985_s20, 2 }
  0x18   : > { %s3474_s27 = scalar_select %p3076_p8, 1, 0 }
  0x19   : > { %s3475_s28 = scalar_select %p3080_p9, 1, 0 }
  0x1a   : > { %s3085_s29 = scalar_select %p52_p7, %s2973_s17, %s54_s24  }
  0x1b   : > { %p3087_p11 = por %p185_p10, %p67_p3  ;;  %s3094_s5 = sand.u32 1, %s2973_s17  }
  0x1c   : > { %3476 = sst [smem:[#allocation22_spill]] %s3085_s29  ;;  %s3097_s6 = sshll.u32 %s3094_s5, 4 }
  0x1d   : > { %s3477_s30 = scalar_select %p3087_p11, 1, 0 }
  0x1e   : > { %s3100_s7 = sshll.u32 %s2981_s19, 8  ;;  %p3104_p0 = pnand %p2703_p13, %p3068_p4 }
  0x1f   : > { %s227_s9 = sand.u32 1, %s2985_s20   ;;  %s3479_s1 = sld [smem:[#allocation24_spill]] }
  0x20   : > { %s231_s13 = scalar_lea.vmem [#allocation8], %s3097_s6  ;;  %s3120_s22 = scalar_lea.sflag [#allocation9], %s227_s9 }
  0x21   : > { %s239_s14 = sshll.u32 %s231_s13, 4  ;;  %p3126_p4 = pneg %p3104_p0  ;;  %s3117_s14 = int_to_ptr.vmem [resolvable:$true] %s239_s14 }
  0x25   : > { %s3113_s12 = scalar_lea.hbm %s3479_s1, %s3100_s7  ;;  %s2780_s11 = scalar_lea.hbm %s3479_s1, 512 }
  0x26   : > { %s2775_s24 = scalar_lea.hbm %s3113_s12, 256  ;;  %p2781_p7 = scmp.lt.u32.totalorder %s3113_s12, %s3479_s1 }
  0x27   : > { %p2776_p3 = scmp.ne.s32.totalorder %s3113_s12, %s2775_s24  ;;  %p2782_p10 = scmp.lt.u32.totalorder %s2780_s11, %s2775_s24 }
  0x28   : > { %p2784_p12 = scmp.lt.u32.totalorder %s2775_s24, %s3113_s12 }
  0x29   : > { %p2778_p5 = pnand %p3126_p4, %p2776_p3  ;;  %p2783_p13 = por %p2782_p10, %p2781_p7 }
  0x2b   : > { %p2779_p6 = pneg %p2778_p5  ;;  %p2785_p1 = por %p2784_p12, %p2783_p13 }
  0x2d   : > { %p2786_p2 = pnand %p2785_p1, %p2779_p6 }
  0x2f   : > { %2789 = shalt.err (!%p2786_p2)
}
  0x30   : > { %s2790_s9 = scalar_lea.vmem %s3117_s14, 256  ;;  %s2987_s26 = smov [#allocation8]  }
  0x31   : > { %p2791_p3 = scmp.ne.s32.totalorder %s3117_s14, %s2790_s9  ;;  %s2795_s10 = sshll.u32 %s2987_s26, 4  ;;  %s2796_s10 = int_to_ptr.vmem [resolvable:$false] %s2795_s10 }
  0x32   : > { %s2797_s23 = scalar_lea.vmem %s2796_s10, 512  ;;  %p2798_p9 = scmp.lt.s32.totalorder %s3117_s14, %s2796_s10 }
  0x33   : > { %p2793_p5 = pnand %p2791_p3, %p3126_p4  ;;  %p2799_p8 = scmp.lt.s32.totalorder %s2797_s23, %s2790_s9 }
  0x35   : > { %p2794_p11 = pneg %p2793_p5  ;;  %p2800_p7 = por %p2799_p8, %p2798_p9 }
  0x37   : > { %p2801_p10 = pnand %p2800_p7, %p2794_p11 }
  0x39   : > { %2804 = shalt.err (!%p2801_p10)
}
  0x3a   : > { %s3459_s24 = smov 128   ;;  %s3461_s11 = smov 8  }
  0x3b   : > { %2692 = dma.hbm_to_vmem [thread:$0]  (!%p3104_p0), %s3113_s12, 256, %s3117_s14, %s3120_s22, %s3459_s24, %s3459_s24, %s3461_s11  }
  0x3c   : > { %p3481_p8 = scmp.lt.s32.totalorder %s2985_s20, 3  ;;  %p3482_p9 = scmp.ge.s32.totalorder %s2985_s20, 1 }
  0x3d   : > { %s3484_s0 = sld [smem:[#allocation23_spill]]  ;;  %s209_s23 = scalar_lea.vmem [#allocation5], %s3097_s6 }
  0x3e   : > { %p3157_p11 = pnand %p3482_p9, %p3481_p8  ;;  %s217_s1 = sshll.u32 %s209_s23, 4  ;;  %s3168_s1 = int_to_ptr.vmem [resolvable:$true] %s217_s1 }
  0x3f   : > { %s3174_s24 = scalar_lea.hbm %s3453_s2, %s3100_s7  ;;  %s206_s11 = scalar_lea.sflag [#allocation6], %s3094_s5 }
  0x40   : > { %s3483_s13 = scalar_select %p3157_p11, 1, 0 }
  0x43   : > { %s3165_s10 = scalar_lea.hbm %s3484_s0, %s3100_s7  ;;  %s2810_s29 = scalar_lea.hbm %s3484_s0, 512 }
  0x44   : > { %s2805_s19 = scalar_lea.hbm %s3165_s10, 256  ;;  %p2811_p6 = scmp.lt.u32.totalorder %s3165_s10, %s3484_s0 }
  0x45   : > { %p2806_p12 = scmp.ne.s32.totalorder %s3165_s10, %s2805_s19  ;;  %p2812_p13 = scmp.lt.u32.totalorder %s2810_s29, %s2805_s19 }
  0x46   : > { %p2814_p5 = scmp.lt.u32.totalorder %s2805_s19, %s3165_s10 }
  0x47   : > { %p2808_p1 = pnand %p2806_p12, %p3126_p4  ;;  %p2813_p3 = por %p2812_p13, %p2811_p6 }
  0x49   : > { %p2809_p2 = pneg %p2808_p1  ;;  %p2815_p7 = por %p2814_p5, %p2813_p3 }
  0x4b   : > { %p2816_p10 = pnand %p2815_p7, %p2809_p2 }
  0x4d   : > { %2819 = shalt.err (!%p2816_p10)
}
  0x4e   : > { %s2820_s23 = scalar_lea.vmem %s3168_s1, 256  ;;  %s2990_s12 = smov [#allocation5]  }
  0x4f   : > { %p2821_p8 = scmp.ne.s32.totalorder %s3168_s1, %s2820_s23  ;;  %s2825_s14 = sshll.u32 %s2990_s12, 4  ;;  %s2826_s14 = int_to_ptr.vmem [resolvable:$false] %s2825_s14 }
  0x50   : > { %s2827_s17 = scalar_lea.vmem %s2826_s14, 512  ;;  %p2828_p1 = scmp.lt.s32.totalorder %s3168_s1, %s2826_s14 }
  0x51   : > { %p2823_p9 = pnand %p2821_p8, %p3126_p4  ;;  %p2829_p11 = scmp.lt.s32.totalorder %s2827_s17, %s2820_s23 }
  0x53   : > { %p2824_p12 = pneg %p2823_p9  ;;  %p2830_p6 = por %p2829_p11, %p2828_p1 }
  0x55   : > { %p2831_p13 = pnand %p2830_p6, %p2824_p12 }
  0x57   : > { %2834 = shalt.err (!%p2831_p13)
}
  0x58   : > { %s3485_s19 = smov 8   ;;  %s3486_s20 = smov 128  }
  0x59   : > { %2689 = dma.hbm_to_vmem [thread:$0]  (!%p3104_p0), %s3165_s10, 256, %s3168_s1, %s206_s11, %s3486_s20, %s3486_s20, %s3485_s19  }
  0x5a   : > { %s253_s29 = scalar_lea.vmem [#allocation10], %s3097_s6  ;;  %s2835_s26 = scalar_lea.hbm %s3174_s24, 256 }
  0x5b   : > { %s261_s9 = sshll.u32 %s253_s29, 4  ;;  %p2836_p11 = scmp.ne.s32.totalorder %s3174_s24, %s2835_s26  ;;  %s3204_s9 = int_to_ptr.vmem [resolvable:$true] %s261_s9 }
  0x5c   : > { %s2840_s14 = scalar_lea.hbm %s3453_s2, 512  ;;  %p2841_p5 = scmp.lt.u32.totalorder %s3174_s24, %s3453_s2 }
  0x5d   : > { %p2838_p2 = pnand %p2836_p11, %p3126_p4  ;;  %p2842_p7 = scmp.lt.u32.totalorder %s2840_s14, %s2835_s26 }
  0x5e   : > { %p2844_p8 = scmp.lt.u32.totalorder %s2835_s26, %s3174_s24 }
  0x5f   : > { %p2839_p3 = pneg %p2838_p2  ;;  %p2843_p10 = por %p2842_p7, %p2841_p5 }
  0x61   : > { %p2845_p9 = por %p2844_p8, %p2843_p10 }
  0x63   : > { %p2846_p12 = pnand %p2845_p9, %p2839_p3 }
  0x65   : > { %2849 = shalt.err (!%p2846_p12)
}
  0x66   : > { %s2850_s1 = scalar_lea.vmem %s3204_s9, 256  ;;  %s2991_s11 = smov [#allocation10]  }
  0x67   : > { %p2851_p1 = scmp.ne.s32.totalorder %s3204_s9, %s2850_s1  ;;  %s2855_s10 = sshll.u32 %s2991_s11, 4  ;;  %s2856_s10 = int_to_ptr.vmem [resolvable:$false] %s2855_s10 }
  0x68   : > { %s2857_s0 = scalar_lea.vmem %s2856_s10, 512  ;;  %p2858_p11 = scmp.lt.s32.totalorder %s3204_s9, %s2856_s10 }
  0x69   : > { %p2853_p6 = pnand %p2851_p1, %p3126_p4  ;;  %p2859_p2 = scmp.lt.s32.totalorder %s2857_s0, %s2850_s1 }
  0x6b   : > { %p2854_p13 = pneg %p2853_p6  ;;  %p2860_p5 = por %p2859_p2, %p2858_p11 }
  0x6d   : > { %p2861_p7 = pnand %p2860_p5, %p2854_p13 }
  0x6f   : > { %2864 = shalt.err (!%p2861_p7)
}
  0x70   : > { %2695 = dma.hbm_to_vmem [thread:$0]  (!%p3104_p0), %s3174_s24, 256, %s3204_s9, %s3120_s22, %s3486_s20, %s3486_s20, %s3485_s19  }
  0x71   : > { %s3235_s23 = scalar_lea.hbm %s3454_s3, %s3100_s7  ;;  %s275_s12 = scalar_lea.vmem [#allocation11], %s3097_s6 }
  0x72   : > { %s284_s14 = sshll.u32 %s275_s12, 4  ;;  %s272_s17 = scalar_lea.sflag [#allocation12], %s3094_s5  ;;  %s3238_s14 = int_to_ptr.vmem [resolvable:$true] %s284_s14 }
  0x73   : > { %s2865_s1 = scalar_lea.hbm %s3235_s23, 256  ;;  %s2870_s9 = scalar_lea.hbm %s3454_s3, 512 }
  0x74   : > { %p2866_p3 = scmp.ne.s32.totalorder %s3235_s23, %s2865_s1  ;;  %p2871_p9 = scmp.lt.u32.totalorder %s3235_s23, %s3454_s3 }
  0x75   : > { %p2872_p12 = scmp.lt.u32.totalorder %s2870_s9, %s2865_s1  ;;  %p2874_p6 = scmp.lt.u32.totalorder %s2865_s1, %s3235_s23 }
  0x76   : > { %p2868_p10 = pnand %p2866_p3, %p3126_p4 }
  0x77   : > { %p2873_p1 = por %p2872_p12, %p2871_p9 }
  0x78   : > { %p2869_p8 = pneg %p2868_p10 }
  0x79   : > { %p2875_p13 = por %p2874_p6, %p2873_p1 }
  0x7b   : > { %p2876_p11 = pnand %p2875_p13, %p2869_p8 }
  0x7d   : > { %2879 = shalt.err (!%p2876_p11)
}
  0x7e   : > { %s2880_s6 = scalar_lea.vmem %s3238_s14, 256  ;;  %s2992_s10 = smov [#allocation11]  }
  0x7f   : > { %p2881_p2 = scmp.ne.s32.totalorder %s3238_s14, %s2880_s6  ;;  %s2885_s0 = sshll.u32 %s2992_s10, 4  ;;  %s2886_s0 = int_to_ptr.vmem [resolvable:$false] %s2885_s0 }
  0x80   : > { %s2887_s29 = scalar_lea.vmem %s2886_s0, 512  ;;  %p2888_p3 = scmp.lt.s32.totalorder %s3238_s14, %s2886_s0 }
  0x81   : > { %p2883_p5 = pnand %p2881_p2, %p3126_p4  ;;  %p2889_p10 = scmp.lt.s32.totalorder %s2887_s29, %s2880_s6 }
  0x83   : > { %p2884_p7 = pneg %p2883_p5  ;;  %p2890_p9 = por %p2889_p10, %p2888_p3 }
  0x85   : > { %p2891_p12 = pnand %p2890_p9, %p2884_p7 }
  0x87   : > { %2894 = shalt.err (!%p2891_p12)
}
  0x88   : > { %2698 = dma.hbm_to_vmem [thread:$0]  (!%p3104_p0), %s3235_s23, 256, %s3238_s14, %s272_s17, %s3486_s20, %s3486_s20, %s3485_s19  }
  0x89   : > { %p3487_p4 = scmp.ne.s32.totalorder %s3483_s13, 0 }
  0x8a   : > { %s3270_s25 = sand.u32 (!%p3487_p4), 1, %s2969_s16   ;;  %p3488_p8 = scmp.ne.s32.totalorder (!%p3487_p4), %s3474_s27, 0 }
  0x8b   : > { %296 = sbr.rel (%p3487_p4) target bundleno = 1022 (0x3fe), region = 36  ;;  %s3273_s26 = sshll.u32 (!%p3487_p4), %s3270_s25, 4 }
  0x8c   : > { %s299_s8 = scalar_lea.sflag (!%p3487_p4), [#allocation6], %s3270_s25  ;;  %s302_s12 = scalar_lea.vmem (!%p3487_p4), [#allocation5], %s3273_s26 }
  0x92   : > { %2948 = dma.done.wait (%p3488_p8), %s299_s8, 256  }
  0x93   : > { %2950 = vsyncadd (%p3488_p8), %s299_s8, 4294967040  ;;  %s307_s5 = sand.u32 1, %s3056_s21   ;;  %s311_s19 = scalar_lea.vmem [#allocation8], %s3273_s26 }
  0x94   : > { %s308_s13 = scalar_lea.sflag [#allocation9], %s307_s5 }
  0x95   : > { %2952 = dma.done.wait (%p3488_p8), %s308_s13, 512  }
  0x96   : > { %2954 = vsyncadd (%p3488_p8), %s308_s13, 4294966784  ;;  %s320_s20 = scalar_lea.vmem [#allocation10], %s3273_s26  ;;  %s326_s23 = scalar_lea.sflag [#allocation12], %s3270_s25 }
  0x97   : > { %s329_s14 = scalar_lea.vmem [#allocation11], %s3273_s26 }
  0x98   : > { %2956 = dma.done.wait (%p3488_p8), %s326_s23, 256  }
  0x99   : > { %2958 = vsyncadd (%p3488_p8), %s326_s23, 4294967040  ;;  %v2993_v0 = vmov 0.0   ;;  %vm2994_vm0 = vmmov 0   ;;  %v389_v1 = vld [vmem:[%s311_s19] sm:$0xff]  ;;  %v390_v2 = vld [vmem:[%s311_s19 + $0x8] sm:$0xff]  ;;  %vm378_vm1 = vcmask 7168  }
  0x9a   : > { %2534 = vmatprep.subr.mxu0 %v2993_v0  ;;  %2564 = vmatprep.subr.mxu1 %v2993_v0  ;;  %v385_v3 = vld [vmem:[%s302_s12] sm:$0xff]  ;;  %v394_v4 = vand.u32 4294901760, %v389_v1  ;;  %v840_v5 = vand.u32 4294901760, %v390_v2  ;;  %v386_v7 = vld [vmem:[%s302_s12 + $0x8] sm:$0xff]  ;;  %v2995_v27 = vmov -1e+30  }
  0x9b   : > { %2536 = vmatprep.mubr.msk.f32.mxu0 %vm2994_vm0, %v2993_v0  ;;  %2566 = vmatprep.mubr.msk.f32.mxu1 %vm2994_vm0, %v2993_v0  ;;  %v387_v6 = vmul.f32 0.088388346, %v385_v3  ;;  %v388_v8 = vmul.f32 0.088388346, %v386_v7  ;;  %379 = vst.msk [vmem:[#allocation2] sm:$0xff] %vm378_vm1, %v2995_v27  ;;  %380 = vst.msk [vmem:[#allocation2 + $0x8] sm:$0xff] %vm378_vm1, %v2995_v27 }
  0x9c   : > { %2535 = vmatpush3.xpose.msra.mxu0 %v394_v4  ;;  %v471_v9 = vsub.f32 %v389_v1, %v394_v4  ;;  %2565 = vmatpush3.xpose.msra.mxu1 %v840_v5  ;;  %v917_v10 = vsub.f32 %v390_v2, %v840_v5  ;;  %381 = vst.msk [vmem:[#allocation3] sm:$0xff] %vm378_vm1, %v2993_v0  ;;  %382 = vst.msk [vmem:[#allocation3 + $0x8] sm:$0xff] %vm378_vm1, %v2993_v0  ;;  %v391_v28 = vld [vmem:[%s329_s14] sm:$0xff]  ;;  %v392_v30 = vld [vmem:[%s329_s14 + $0x8] sm:$0xff]  ;;  %vm1287_vm2 = vcmask 64512   ;;  %v2996_v38 = vmov 0  }
  0x9d   : > { %v459_v11 = vand.u32 4294901760, %v387_v6  ;;  %2539 = vmatprep.subr.mxu0 %v2993_v0  ;;  %v905_v12 = vand.u32 4294901760, %v388_v8  ;;  %2569 = vmatprep.subr.mxu1 %v2993_v0  ;;  %v1347_v47 = vld [vmem:[%s320_s20] sm:$0xff]  ;;  %v1348_v58 = vld [vmem:[%s320_s20 + $0x8] sm:$0xff]  ;;  %s368_s21 = scalar_lea.vmem [#allocation13], %s3273_s26  ;;  %s2485_s17 = sshll.u32 %s2977_s18, 8 }
  0x9e   : > { %v472_v14 = vand.u32 4294901760, %v471_v9  ;;  %v918_v15 = vand.u32 4294901760, %v917_v10  ;;  %2761 = vset.pattern.permute.xlu1 %v2996_v38  ;;  %2762 = vset.pattern.permute.xlu0 %v2996_v38  ;;  %v1353_v48 = vand.u32 4294901760, %v1347_v47  ;;  %v1802_v60 = vand.u32 4294901760, %v1348_v58  ;;  %s2293_s27 = sshll.u32 %s368_s21, 4  ;;  %s3402_s24 = scalar_lea.hbm %s3455_s4, %s2485_s17  ;;  %s3397_s27 = int_to_ptr.vmem [resolvable:$true] %s2293_s27 }
  0x9f   : > { %v460_v13 = vsub.f32 %v387_v6, %v459_v11  ;;  %v906_v16 = vsub.f32 %v388_v8, %v905_v12  ;;  %s2279_s9 = scalar_lea.sflag [#allocation7], %s3270_s25  ;;  %s2895_s7 = scalar_lea.vmem %s3397_s27, 256 }
  0xa0   : > { %v473_v18 = vsub.f32 %v471_v9, %v472_v14  ;;  %v919_v19 = vsub.f32 %v917_v10, %v918_v15  ;;  %v1430_v49 = vsub.f32 %v1347_v47, %v1353_v48  ;;  %v3356_v61 = vsub.f32 %v1348_v58, %v1802_v60  ;;  %p2896_p0 = scmp.ne.s32.totalorder %s3397_s27, %s2895_s7  ;;  %p3489_p1 = scmp.ne.s32.totalorder %s3475_s28, 0 }
  0xa1   : > { %v461_v17 = vand.u32 4294901760, %v460_v13  ;;  %v907_v20 = vand.u32 4294901760, %v906_v16  ;;  %s2997_s18 = smov [#allocation13]  }
  0xa2   : > { %v474_v22 = vand.u32 4294901760, %v473_v18  ;;  %v920_v25 = vand.u32 4294901760, %v919_v19  ;;  %v1285_v39 = vld [vmem:[#allocation2] sm:$0xff]  ;;  %v1286_v42 = vld [vmem:[#allocation2 + $0x8] sm:$0xff]  ;;  %v1431_v50 = vand.u32 4294901760, %v1430_v49  ;;  %v1880_v3 = vand.u32 4294901760, %v3356_v61  ;;  %p2897_p6 = pnand %p2896_p0, %p3489_p1 }
  0xa3   : > { %v462_v21 = vsub.f32 %v460_v13, %v461_v17  ;;  %v908_v23 = vsub.f32 %v906_v16, %v907_v20  ;;  %s2899_s11 = sshll.u32 %s2997_s18, 4  ;;  %s2900_s11 = int_to_ptr.vmem [resolvable:$false] %s2899_s11 }
  0xa4   : > { %v1432_v51 = vsub.f32 %v1430_v49, %v1431_v50  ;;  %p2898_p13 = pneg %p2897_p6  ;;  %s2901_s6 = scalar_lea.vmem %s2900_s11, 512 }
  0xa5   : > { %v463_v24 = vand.u32 4294901760, %v462_v21  ;;  %v909_v26 = vand.u32 4294901760, %v908_v23  ;;  %p2902_p11 = scmp.lt.s32.totalorder %s3397_s27, %s2900_s11  ;;  %p2903_p2 = scmp.lt.s32.totalorder %s2901_s6, %s2895_s7 }
  0xa6   : > { %v1433_v52 = vand.u32 4294901760, %v1432_v51 }
  0xa7   : > { %2537 = vmatmul.mubr.f32.vlgmr.msra.gmra.mrb[0].mxu0 %v463_v24  ;;  %2567 = vmatmul.mubr.f32.vlgmr.msra.gmra.mrb[0].mxu1 %v909_v26  ;;  %p2904_p5 = por %p2903_p2, %p2902_p11 }
  0xa8   : > { %2540 = vmatpush3.xpose.msra.mxu0 %v474_v22  ;;  %2570 = vmatpush3.xpose.msra.mxu1 %v920_v25  ;;  %v1318_v22 = vld [vmem:[#allocation3] sm:$0xff]  ;;  %v1319_v25 = vld [vmem:[#allocation3 + $0x8] sm:$0xff] }
  0xa9   : > { %2541 = vmatprep.mubr.msk.f32.mxu0 %vm2994_vm0, %v2993_v0  ;;  %2544 = vmatprep.subr.mxu0 %v2993_v0  ;;  %p2905_p7 = pnand %p2904_p5, %p2898_p13 }
  0xaa   : > { %2571 = vmatprep.mubr.msk.f32.mxu1 %vm2994_vm0, %v2993_v0  ;;  %2574 = vmatprep.subr.mxu1 %v2993_v0 }
  0xaf   : > { %2542 = vmatmul.mubr.f32.vlgmr.msra.gmra.mrb[0].mxu0 %v459_v11  ;;  %2572 = vmatmul.mubr.f32.vlgmr.msra.gmra.mrb[0].mxu1 %v905_v12 }
  0xb0   : > { %2545 = vmatpush3.xpose.msra.mxu0 %v471_v9  ;;  %2575 = vmatpush3.xpose.msra.mxu1 %v917_v10  ;;  %v1881_v9 = vsub.f32 %v3356_v61, %v1880_v3 }
  0xb1   : > { %2546 = vmatprep.mubr.msk.f32.mxu0 %vm2994_vm0, %v2993_v0  ;;  %2549 = vmatprep.subr.mxu0 %v2993_v0 }
  0xb2   : > { %2576 = vmatprep.mubr.msk.f32.mxu1 %vm2994_vm0, %v2993_v0  ;;  %2579 = vmatprep.subr.mxu1 %v2993_v0 }
  0xb7   : > { %2547 = vmatmul.mubr.f32.vlgmr.msra.gmra.mrb[0].mxu0 %v460_v13  ;;  %2577 = vmatmul.mubr.f32.vlgmr.msra.gmra.mrb[0].mxu1 %v906_v16 }
  0xb8   : > { %2550 = vmatpush3.xpose.msra.mxu0 %v394_v4  ;;  %2580 = vmatpush3.xpose.msra.mxu1 %v840_v5 }
  0xb9   : > { %2551 = vmatprep.mubr.msk.f32.mxu0 %vm2994_vm0, %v2993_v0  ;;  %2554 = vmatprep.subr.mxu0 %v2993_v0 }
  0xba   : > { %2581 = vmatprep.mubr.msk.f32.mxu1 %vm2994_vm0, %v2993_v0  ;;  %2584 = vmatprep.subr.mxu1 %v2993_v0 }
  0xbf   : > { %2552 = vmatmul.mubr.f32.vlgmr.msra.gmra.mrb[0].mxu0 %v461_v17  ;;  %2582 = vmatmul.mubr.f32.vlgmr.msra.gmra.mrb[0].mxu1 %v907_v20 }
  0xc0   : > { %2555 = vmatpush3.xpose.msra.mxu0 %v472_v14  ;;  %2585 = vmatpush3.xpose.msra.mxu1 %v918_v15  ;;  %v1882_v15 = vand.u32 4294901760, %v1881_v9 }
  0xc1   : > { %2556 = vmatprep.mubr.msk.f32.mxu0 %vm2994_vm0, %v2993_v0  ;;  %2559 = vmatprep.subr.mxu0 %v2993_v0 }
  0xc2   : > { %2586 = vmatprep.mubr.msk.f32.mxu1 %vm2994_vm0, %v2993_v0  ;;  %2589 = vmatprep.subr.mxu1 %v2993_v0 }
  0xc7   : > { %2557 = vmatmul.mubr.f32.vlgmr.msra.gmra.mrb[0].mxu0 %v459_v11  ;;  %2587 = vmatmul.mubr.f32.vlgmr.msra.gmra.mrb[0].mxu1 %v905_v12 }
  0xc8   : > { %2560 = vmatpush3.xpose.msra.mxu0 %v394_v4  ;;  %2590 = vmatpush3.xpose.msra.mxu1 %v840_v5 }
  0xc9   : > { %2561 = vmatprep.mubr.msk.f32.mxu0 %vm2994_vm0, %v2993_v0  ;;  %2591 = vmatprep.mubr.msk.f32.mxu1 %vm2994_vm0, %v2993_v0 }
  0xca   : > { %2599 = vmatprep.subr.mxu1 %v2993_v0  ;;  %2594 = vmatprep.subr.mxu0 %v2993_v0 }
  0xcf   : > { %2562 = vmatmul.mubr.f32.vlgmr.msra.gmra.mrb[0].mxu0 %v459_v11  ;;  %2592 = vmatmul.mubr.f32.vlgmr.msra.gmra.mrb[0].mxu1 %v905_v12 }
  0xd0   : > { %2596 = vmatprep.mubr.msk.f32.mxu0 %vm2994_vm0, %v2993_v0  ;;  %2601 = vmatprep.mubr.msk.f32.mxu1 %vm2994_vm0, %v2993_v0 }
  0xd1   : > { %2595 = vmatpush3.msra.mxu0 %v1353_v48  ;;  %2600 = vmatpush3.msra.mxu1 %v1433_v52 }
  0xd2   : > { %2604 = vmatprep.subr.mxu0 %v2993_v0  ;;  %2609 = vmatprep.subr.mxu1 %v2993_v0 }
 0x1a2   : > { %v835_v29 = vpop.f32.mrb[0].mxu0  ;;  %v1281_v32 = vpop.f32.mrb[0].mxu1 }
 0x1a3   : > { %v2654_v31 = vadd.f32 %v835_v29, %v391_v28  ;;  %v2563_v33 = vpop.f32.mrb[1].mxu0  ;;  %v2593_v34 = vpop.f32.mrb[1].mxu1  ;;  %v2655_v35 = vadd.f32 %v1281_v32, %v392_v30 }
 0x1a5   : > { %v1288_v36 = vsel %vm1287_vm2, %v2654_v31, -inf  ;;  %v1291_v37 = vsel %vm1287_vm2, %v2655_v35, -inf }
 0x1a6   : > { %1289 = vmax.xlane.f32.xlu0 %v1288_v36 }
 0x1aa   : > { %1292 = vmax.xlane.f32.xlu0 %v1291_v37 }
 0x233   : > { %v1290_v40 = vpop.xlane.xlu0 %1289 }
 0x234   : > { %v1294_v41 = vmax.f32 %v1285_v39, %v1290_v40 }
 0x236   : > { %v1296_v43 = vsub.f32 %v1285_v39, %v1294_v41  ;;  %2251 = vst.msk [vmem:[#allocation2] sm:$0xff] %vm378_vm1, %v1294_v41  ;;  %1304 = vperm.xlu1 %2761, %v1294_v41  }
 0x237   : > { %v1293_v44 = vpop.xlane.xlu0 %1292 }
 0x238   : > { %v1295_v45 = vmax.f32 %v1286_v42, %v1293_v44  ;;  %v1298_v13 = vmul.f32 1.442695, %v1296_v43 }
 0x23a   : > { %v1297_v46 = vsub.f32 %v1286_v42, %v1295_v45  ;;  %2252 = vst.msk [vmem:[#allocation2 + $0x8] sm:$0xff] %vm378_vm1, %v1295_v45  ;;  %1309 = vperm.xlu1 %2761, %v1295_v45  }
 0x23c   : > { %v1300_v11 = vmul.f32 1.442695, %v1297_v46 }
 0x2b5   : > { %v1305_v53 = vpop.permute.xlu1 %1304 }
 0x2b6   : > { %v1312_v54 = vsub.f32 %v2654_v31, %v1305_v53 }
 0x2b8   : > { %v1314_v55 = vmul.f32 1.442695, %v1312_v54 }
 0x2b9   : > { %v1310_v56 = vpop.permute.xlu1 %1309 }
 0x2ba   : > { %2763 = vpow2.f32 %v1314_v55  ;;  %v1313_v57 = vsub.f32 %v2655_v35, %v1310_v56 }
 0x2bc   : > { %v1316_v59 = vmul.f32 1.442695, %v1313_v57 }
 0x2be   : > { %2765 = vpow2.f32 %v1316_v59 }
 0x2bf   : > { %2767 = vpow2.f32 %v1300_v11 }
 0x2c0   : > { %2769 = vpow2.f32 %v1298_v13 }
 0x2c4   : > { %v2764_v62 = vpop.eup %2763 }
 0x2c5   : > { %v1322_v63 = vsel %vm1287_vm2, %v2764_v62, 0.0  ;;  %v1350_v1 = vsel %vm1287_vm2, %v2764_v62, 0 }
 0x2c6   : > { %1323 = vadd.xlane.f32.xlu0 %v1322_v63  ;;  %v1418_v2 = vand.u32 4294901760, %v1350_v1 }
 0x2c8   : > { %v2766_v4 = vpop.eup %2765  ;;  %v1419_v5 = vsub.f32 %v1350_v1, %v1418_v2  ;;  %2602 = vmatmul.mubr.f32.vlgmr.msra.gmra.mrb[2].mxu1 %v1418_v2 }
 0x2c9   : > { %v1325_v6 = vsel %vm1287_vm2, %v2766_v4, 0.0  ;;  %2610 = vmatpush3.msra.mxu1 %v1353_v48  ;;  %2611 = vmatprep.mubr.msk.f32.mxu1 %vm2994_vm0, %v2993_v0  ;;  %v1799_v7 = vsel %vm1287_vm2, %v2766_v4, 0  ;;  %v2768_v19 = vpop.eup %2767 }
 0x2ca   : > { %1326 = vadd.xlane.f32.xlu1 %v1325_v6  ;;  %v1420_v8 = vand.u32 4294901760, %v1419_v5  ;;  %2619 = vmatprep.subr.mxu1 %v2993_v0  ;;  %v1867_v10 = vand.u32 4294901760, %v1799_v7  ;;  %v2770_v21 = vpop.eup %2769  ;;  %v1321_v27 = vmul.f32 %v2768_v19, %v1319_v25 }
 0x2cb   : > { %v1320_v23 = vmul.f32 %v2770_v21, %v1318_v22 }
 0x2cc   : > { %2612 = vmatmul.mubr.f32.vlgmr.msra.gmra.mrb[4].mxu1 %v1420_v8  ;;  %v1421_v12 = vsub.f32 %v1419_v5, %v1420_v8  ;;  %v1868_v16 = vsub.f32 %v1799_v7, %v1867_v10 }
 0x2cd   : > { %2620 = vmatpush3.msra.mxu1 %v1353_v48  ;;  %2621 = vmatprep.mubr.msk.f32.mxu1 %vm2994_vm0, %v2993_v0 }
 0x2ce   : > { %v1422_v14 = vand.u32 4294901760, %v1421_v12  ;;  %2629 = vmatprep.subr.mxu1 %v2993_v0  ;;  %v1869_v17 = vand.u32 4294901760, %v1868_v16 }
 0x2d0   : > { %2597 = vmatmul.mubr.f32.vlgmr.msra.gmra.mrb[2].mxu0 %v1422_v14  ;;  %2622 = vmatmul.mubr.f32.vlgmr.msra.gmra.mrb[6].mxu1 %v1418_v2  ;;  %v1870_v18 = vsub.f32 %v1868_v16, %v1869_v17 }
 0x2d1   : > { %2605 = vmatpush3.msra.mxu0 %v1430_v49  ;;  %2606 = vmatprep.mubr.msk.f32.mxu0 %vm2994_vm0, %v2993_v0 }
 0x2d2   : > { %2630 = vmatpush3.msra.mxu1 %v1882_v15  ;;  %2631 = vmatprep.mubr.msk.f32.mxu1 %vm2994_vm0, %v2993_v0  ;;  %v1871_v20 = vand.u32 4294901760, %v1870_v18 }
 0x2d3   : > { %2614 = vmatprep.subr.mxu0 %v2993_v0  ;;  %2639 = vmatprep.subr.mxu1 %v2993_v0 }
 0x2d4   : > { %2607 = vmatmul.mubr.f32.vlgmr.msra.gmra.mrb[4].mxu0 %v1419_v5  ;;  %2632 = vmatmul.mubr.f32.vlgmr.msra.gmra.mrb[8].mxu1 %v1867_v10 }
 0x2d5   : > { %2615 = vmatpush3.msra.mxu0 %v1431_v50  ;;  %2616 = vmatprep.mubr.msk.f32.mxu0 %vm2994_vm0, %v2993_v0 }
 0x2d6   : > { %2640 = vmatpush3.msra.mxu1 %v1802_v60  ;;  %2641 = vmatprep.mubr.msk.f32.mxu1 %vm2994_vm0, %v2993_v0 }
 0x2d7   : > { %2624 = vmatprep.subr.mxu0 %v2993_v0  ;;  %2649 = vmatprep.subr.mxu1 %v2993_v0 }
 0x2d8   : > { %2617 = vmatmul.mubr.f32.vlgmr.msra.gmra.mrb[6].mxu0 %v1418_v2  ;;  %2642 = vmatmul.mubr.f32.vlgmr.msra.gmra.mrb[10].mxu1 %v1869_v17 }
 0x2d9   : > { %2625 = vmatpush3.msra.mxu0 %v1802_v60  ;;  %2626 = vmatprep.mubr.msk.f32.mxu0 %vm2994_vm0, %v2993_v0 }
 0x2da   : > { %2650 = vmatpush3.msra.mxu1 %v1802_v60  ;;  %2651 = vmatprep.mubr.msk.f32.mxu1 %vm2994_vm0, %v2993_v0 }
 0x2db   : > { %1342 = vperm.xlu1 %2761, %v2768_v19   ;;  %2634 = vmatprep.subr.mxu0 %v2993_v0 }
 0x2dc   : > { %2627 = vmatmul.mubr.f32.vlgmr.msra.gmra.mrb[8].mxu0 %v1871_v20  ;;  %2652 = vmatmul.mubr.f32.vlgmr.msra.gmra.mrb[12].mxu1 %v1867_v10 }
 0x2dd   : > { %1337 = vperm.xlu0 %2762, %v2770_v21   ;;  %2635 = vmatpush3.msra.mxu0 %v3356_v61 }
 0x2de   : > { %2636 = vmatprep.mubr.msk.f32.mxu0 %vm2994_vm0, %v2993_v0  ;;  %2644 = vmatprep.subr.mxu0 %v2993_v0 }
 0x2e0   : > { %2637 = vmatmul.mubr.f32.vlgmr.msra.gmra.mrb[10].mxu0 %v1868_v16 }
 0x2e1   : > { %2645 = vmatpush3.msra.mxu0 %v1880_v3  ;;  %2646 = vmatprep.mubr.msk.f32.mxu0 %vm2994_vm0, %v2993_v0 }
 0x2e4   : > { %2647 = vmatmul.mubr.f32.vlgmr.msra.gmra.mrb[12].mxu0 %v1867_v10 }
 0x353   : > { %v1324_v24 = vpop.xlane.xlu0 %1323 }
 0x354   : > { %v1328_v26 = vadd.f32 %v1324_v24, %v1320_v23 }
 0x356   : > { %1331 = vst.msk [vmem:[#allocation3] sm:$0xff] %vm378_vm1, %v1328_v26 }
 0x357   : > { %v1327_v28 = vpop.xlane.xlu1 %1326 }
 0x358   : > { %v1329_v29 = vadd.f32 %v1327_v28, %v1321_v27 }
 0x35a   : > { %1332 = vst.msk [vmem:[#allocation3 + $0x8] sm:$0xff] %vm378_vm1, %v1329_v29 }
 0x35b   : > { %v1343_v6 = vpop.permute.xlu1 %1342 }
 0x35c   : > { %v1338_v4 = vpop.permute.xlu0 %1337  ;;  %v1346_v9 = vmul.f32 0.0, %v1343_v6 }
 0x35d   : > { %v2256_v30 = vld [vmem:[#allocation3] sm:$0xff]  ;;  %v1345_v5 = vmul.f32 0.0, %v1338_v4 }
 0x35e   : > { %2771 = vrcp.f32 %v2256_v30 }
 0x361   : > { %v2257_v31 = vld [vmem:[#allocation3 + $0x8] sm:$0xff] }
 0x362   : > { %2773 = vrcp.f32 %v2257_v31 }
 0x368   : > { %v2772_v32 = vpop.eup %2771 }
 0x369   : > { %2266 = vperm.xlu0 %2762, %v2772_v32  }
 0x36c   : > { %v2774_v0 = vpop.eup %2773 }
 0x36d   : > { %2271 = vperm.xlu0 %2762, %v2774_v0  }
 0x39b   : > { %v1500_v33 = vpop.f32.mrb[2].mxu1 }
 0x39c   : > { %v2603_v34 = vpop.f32.mrb[3].mxu1 }
 0x39f   : > { %v1648_v35 = vpop.f32.mrb[4].mxu1 }
 0x3a0   : > { %v2613_v36 = vpop.f32.mrb[5].mxu1 }
 0x3a3   : > { %v1424_v37 = vpop.f32.mrb[2].mxu0  ;;  %v1794_v38 = vpop.f32.mrb[6].mxu1 }
 0x3a4   : > { %v1501_v39 = vadd.f32 %v1500_v33, %v1424_v37  ;;  %v2598_v40 = vpop.f32.mrb[3].mxu0  ;;  %v2623_v41 = vpop.f32.mrb[7].mxu1 }
 0x3a7   : > { %v1574_v42 = vpop.f32.mrb[4].mxu0  ;;  %v1949_v43 = vpop.f32.mrb[8].mxu1 }
 0x3a8   : > { %v1575_v44 = vadd.f32 %v1574_v42, %v1501_v39  ;;  %v2608_v45 = vpop.f32.mrb[5].mxu0  ;;  %v2633_v46 = vpop.f32.mrb[9].mxu1 }
 0x3aa   : > { %v1649_v47 = vadd.f32 %v1648_v35, %v1575_v44 }
 0x3ab   : > { %v1722_v48 = vpop.f32.mrb[6].mxu0  ;;  %v2097_v49 = vpop.f32.mrb[10].mxu1 }
 0x3ac   : > { %v1723_v50 = vadd.f32 %v1722_v48, %v1649_v47  ;;  %v2618_v51 = vpop.f32.mrb[7].mxu0  ;;  %v2643_v52 = vpop.f32.mrb[11].mxu1 }
 0x3ae   : > { %v1795_v53 = vadd.f32 %v1794_v38, %v1723_v50 }
 0x3af   : > { %v1873_v54 = vpop.f32.mrb[8].mxu0  ;;  %v2243_v55 = vpop.f32.mrb[12].mxu1 }
 0x3b0   : > { %v1950_v56 = vadd.f32 %v1949_v43, %v1873_v54  ;;  %v2628_v57 = vpop.f32.mrb[9].mxu0  ;;  %v2653_v58 = vpop.f32.mrb[13].mxu1  ;;  %v2247_v7 = vadd.f32 %v1795_v53, %v1345_v5 }
 0x3b3   : > { %v2023_v59 = vpop.f32.mrb[10].mxu0 }
 0x3b4   : > { %v2024_v60 = vadd.f32 %v2023_v59, %v1950_v56  ;;  %v2638_v61 = vpop.f32.mrb[11].mxu0 }
 0x3b6   : > { %v2098_v62 = vadd.f32 %v2097_v49, %v2024_v60 }
 0x3b7   : > { %v2171_v63 = vpop.f32.mrb[12].mxu0 }
 0x3b8   : > { %v2172_v1 = vadd.f32 %v2171_v63, %v2098_v62  ;;  %v2648_v2 = vpop.f32.mrb[13].mxu0 }
 0x3ba   : > { %v2244_v3 = vadd.f32 %v2243_v55, %v2172_v1 }
 0x3bc   : > { %v2248_v11 = vadd.f32 %v2244_v3, %v1346_v9 }
 0x3e8   : > { %v2267_v8 = vpop.permute.xlu0 %2266 }
 0x3e9   : > { %v2274_v10 = vmul.f32 %v2267_v8, %v2247_v7 }
 0x3eb   : > { %2276 = vst [vmem:[%s368_s21] sm:$0xff] %v2274_v10 }
 0x3ec   : > { %v2272_v12 = vpop.permute.xlu0 %2271 }
 0x3ed   : > { %v2275_v13 = vmul.f32 %v2272_v12, %v2248_v11 }
 0x3ef   : > { %2277 = vst [vmem:[%s368_s21 + $0x8] sm:$0xff] %v2275_v13 }
 0x3f0   : > { %2908 = shalt.err (!%p2905_p7)
}
 0x3f1   : > { %s2909_s10 = scalar_lea.hbm %s3402_s24, 256  ;;  %s2913_s26 = scalar_lea.hbm %s3455_s4, 512 }
 0x3f2   : > { %p2910_p3 = scmp.ne.s32.totalorder %s3402_s24, %s2909_s10  ;;  %p2914_p12 = scmp.lt.u32.totalorder %s3402_s24, %s3455_s4 }
 0x3f3   : > { %p2915_p4 = scmp.lt.u32.totalorder %s2913_s26, %s2909_s10  ;;  %p2917_p0 = scmp.lt.u32.totalorder %s2909_s10, %s3402_s24 }
 0x3f4   : > { %p2911_p10 = pnand %p2910_p3, %p3489_p1 }
 0x3f5   : > { %p2916_p8 = por %p2915_p4, %p2914_p12 }
 0x3f6   : > { %p2912_p9 = pneg %p2911_p10 }
 0x3f7   : > { %p2918_p6 = por %p2917_p0, %p2916_p8 }
 0x3f9   : > { %p2919_p13 = pnand %p2918_p6, %p2912_p9 }
 0x3fb   : > { %2922 = shalt.err (!%p2919_p13)
}
 0x3fc   : > { %s2998_s5 = smov 128   ;;  %s2999_s13 = smov 8  }
 0x3fd   : > { %2684 = dma.vmem_to_hbm [thread:$0]  (%p3489_p1), %s3397_s27, 256, %s3402_s24, %s2279_s9, %s2998_s5, %s2998_s5, %s2999_s13  }
 0x3fe PF: > { %s3490_s19 = sld [smem:[#allocation20_spill]]  ;;  %s2308_s20 = sand.u32 1, %s2965_s15  }
 0x3ff   : > { %p3491_p11 = scmp.ne.s32.totalorder %s3477_s30, 0  ;;  %s2309_s23 = scalar_lea.sflag [#allocation7], %s2308_s20 }
 0x404   : > { %p3492_p2 = scmp.ge.s32.totalorder %s3490_s19, 2 }
 0x406   : > { %p2700_p5 = pnand %p3492_p2, %p3491_p11 }
 0x408   : > { %2960 = dma.done.wait (!%p2700_p5), %s2309_s23, 256  }
 0x409   : > { %2962 = vsyncadd (!%p2700_p5), %s2309_s23, 4294967040  ;;  %s26_s20 = sadd.s32 1, %s3490_s19   ;;  %s3493_s14 = sld [smem:[#allocation18_spill]] }
 0x40a   : > { %p23_p7 = scmp.ge.s32.totalorder %s26_s20, 4   ;;  %s3494_s17 = sld [smem:[#allocation22_spill]] }
 0x40b   : > { %s3495_s18 = sld [smem:[#allocation19_spill]]  ;;  %s3496_s19 = sld [smem:[#allocation21_spill]] }
 0x40c   : > { %s3497_s15 = smov %s2969_s16  ;;  %25 = sbr.rel (!%p23_p7) target bundleno = 13 (0xd), region = 126 }
 0x40f   : > { %s3498_s16 = smov %s3493_s14 }
 0x413   :  { %2314 = vsyncpa [#allocation6], 1 }
 0x414   :  { %2316 = vsyncpa [#allocation6 + $0x1], 1 }
 0x415   :  { %2317 = vsyncpa [#allocation9], 1 }
 0x416   :  { %2319 = vsyncpa [#allocation9 + $0x1], 1 }
 0x417   :  { %2320 = vsyncpa [#allocation12], 1 }
 0x418   :  { %2322 = vsyncpa [#allocation12 + $0x1], 1 }
 0x419   :  { %2323 = vsyncpa [#allocation7], 1 }
 0x41a   :  { %2325 = vsyncpa [#allocation7 + $0x1], 1 }

</bundles_post_ra>
